<compile_context>
chip_gen: v5e
topology: v5e:2x2
jax: 0.10.0
libtpu: 0.0.40
codegen_flags: <defaults>
</compile_context>

<pallas_src>
import functools

import jax
import jax.numpy as jnp
from jax.experimental import pallas as pl
from jax.experimental.pallas import tpu as pltpu


# ----------------------------- kernel -----------------------------------------


def _fused_kernel(x_ref, w1_ref, b1_ref, w2_ref, b2_ref, out_ref, *,
                  action_space, softmax_dim, include_pi, valid_rows):
    # hidden = relu(x @ W1 + b1); accumulate in f32, epilogue in f32 (v5e-safe).
    h = jnp.dot(x_ref[...], w1_ref[...], preferred_element_type=jnp.float32)
    h = jnp.maximum(h + b1_ref[...], 0.0)

    # combined head: columns [0, A) = pi logits, column A = v, rest zero pad.
    # One lane-dense (H, 128) matmul instead of two narrow ones.
    z = jnp.dot(h.astype(w2_ref.dtype), w2_ref[...],
                preferred_element_type=jnp.float32)
    z = z + b2_ref[...]

    if include_pi:
        # (1, PAD) column mask broadcast over rows — cheaper than a full-tile iota.
        col = jax.lax.broadcasted_iota(jnp.int32, (1, z.shape[-1]), 1)
        is_pi = col < action_space
        if softmax_dim == 1:
            zm = jnp.where(is_pi, z, -jnp.inf)
            m = jnp.max(zm, axis=1, keepdims=True)
            e = jnp.exp(zm - m)                      # masked cols: exp(-inf) = 0
            denom = jnp.sum(e, axis=1, keepdims=True)
        else:
            # softmax over the batch axis: whole batch lives in this block.
            # Mask rows beyond the real batch (ragged single block).
            row = jax.lax.broadcasted_iota(jnp.int32, (z.shape[0], 1), 0)
            zr = jnp.where(row < valid_rows, z, -jnp.inf)
            m = jnp.max(zr, axis=0, keepdims=True)
            e = jnp.exp(zr - m)
            denom = jnp.sum(e, axis=0, keepdims=True)
        # exact reciprocal of the small reduction column (probs feed PPO ratios)
        probs = e * (1.0 / denom)
        out = jnp.where(is_pi, probs, z)   # keep v (and pad) columns as raw z
    else:
        out = z

    out_ref[...] = out.astype(out_ref.dtype)


# ----------------------------- wrappers ----------------------------------------


def pack_params(params, compute_dtype=jnp.bfloat16, lane_pad=128):
    """Pack pi/v heads into one lane-padded weight. Call once, reuse per step.

    compute_dtype=bf16 feeds the bf16-native MXUs of v6e/v7x at full rate and
    halves x/weight DMA; accumulation and the relu/softmax epilogue stay f32.
    Pass jnp.float32 if critic precision matters for advantage estimation.
    """
    w1, b1 = params["w1"], params["b1"]
    wpi, bpi = params["wpi"], params["bpi"]
    wv, bv = params["wv"], params["bv"]
    S, H = w1.shape
    A = wpi.shape[1]
    PAD = pl.cdiv(A + 1, lane_pad) * lane_pad

    w2 = jnp.zeros((H, PAD), jnp.float32)
    w2 = w2.at[:, :A].set(wpi).at[:, A].set(wv[:, 0])
    b2 = jnp.zeros((1, PAD), jnp.float32)
    b2 = b2.at[:, :A].set(bpi.reshape(1, A)).at[:, A].set(bv[0])

    return dict(
        w1=w1.astype(compute_dtype),
        b1=b1.reshape(1, H).astype(jnp.float32),
        w2=w2.astype(compute_dtype),
        b2=b2,
        action_space=A,
        pad=PAD,
        compute_dtype=compute_dtype,
    )


def _choose_tb(B, tb):
    """Sublane-aligned batch tile; keep >=2 grid steps for v7x megacore when
    each half is still large enough to amortize the ~0.35us per-step overhead."""
    align = lambda n: max(8, ((n + 7) // 8) * 8)
    tb = align(min(tb, B))
    if tb >= B and B >= 2048:
        tb = align(pl.cdiv(B, 2))
    return tb


def _vmem_limit(TB, S, H, PAD, in_itemsize, out_itemsize, resident_bytes):
    """Footprint-derived scoped-VMEM limit, clamped to [32 MiB, 64 MiB]."""
    need = (2 * TB * S * in_itemsize          # x tile, double-buffered
            + 2 * TB * PAD * out_itemsize     # out tile, double-buffered
            + 4 * TB * (H + 2 * PAD)          # f32 hidden + epilogue temps
            + 2 * resident_bytes)             # weights/biases (worst case 2 bufs)
    return int(min(max(int(need * 1.5), 32 * 1024 * 1024), 64 * 1024 * 1024))


def _fused_call(x, packed, softmax_dim, include_pi, tb=4096,
                out_dtype=jnp.float32):
    A, PAD = packed["action_space"], packed["pad"]
    w1, b1, w2, b2 = packed["w1"], packed["b1"], packed["w2"], packed["b2"]
    S, H = w1.shape
    B = x.shape[0]
    x = x.astype(packed["compute_dtype"])
    softmax_dim = softmax_dim % 2 if include_pi else 1

    if include_pi and softmax_dim == 0:
        # Softmax over the batch axis: keep the whole batch in a single block so
        # the reduction is exact.  Single block => no pipelining / no megacore
        # split; VMEM caps the batch around ~25-30k rows on v7x (64 MiB).
        # TODO(synk): two-pass grid reduction (per-column max/sum scratch) would
        # remove this batch ceiling and restore the v7x megacore split.
        TB = max(8, ((B + 7) // 8) * 8)
    else:
        TB = _choose_tb(B, tb)

    grid = (pl.cdiv(B, TB),)
    kernel = functools.partial(_fused_kernel, action_space=A,
                               softmax_dim=softmax_dim, include_pi=include_pi,
                               valid_rows=B)

    resident_bytes = sum(a.size * a.dtype.itemsize for a in (w1, b1, w2, b2))
    vmem_bytes = _vmem_limit(TB, S, H, PAD,
                             jnp.dtype(packed["compute_dtype"]).itemsize,
                             jnp.dtype(out_dtype).itemsize, resident_bytes)

    def call(resident_mode):
        def rspec(shape):
            if resident_mode is None:
                return pl.BlockSpec(shape, lambda i: (0, 0))
            return pl.BlockSpec(shape, lambda i: (0, 0),
                                pipeline_mode=resident_mode)

        return pl.pallas_call(
            kernel,
            out_shape=jax.ShapeDtypeStruct((B, PAD), out_dtype),
            grid=grid,
            in_specs=[
                pl.BlockSpec((TB, S), lambda i: (i, 0)),   # x: tiled on batch
                rspec(w1.shape),                           # weights/biases stay
                rspec(b1.shape),                           # VMEM-resident
                rspec(w2.shape),
                rspec(b2.shape),
            ],
            out_specs=pl.BlockSpec((TB, PAD), lambda i: (i, 0)),  # lane-dense
            compiler_params=pltpu.CompilerParams(
                dimension_semantics=("parallel",),
                vmem_limit_bytes=vmem_bytes),
        )(x, w1, b1, w2, b2)

    try:
        # Constant index_map -> one buffer is enough for the resident operands.
        out = call(pl.Buffered(1))
    except Exception:
        # Fallback for jax versions without per-BlockSpec pipeline_mode support.
        out = call(None)
    return out


def ann_ppo_forward(x, packed, model_type, softmax_dim=0, out_dtype=None):
    """Mirrors ANNPPO.forward(x, model_type, softmax_dim) — one head per call.

    For the PPO update path prefer ann_ppo_forward_both: separate 'pi'/'v'
    calls each rerun both matmuls and a full HBM pass just to slice a few cols.
    """
    A = packed["action_space"]
    if model_type == "v":
        # critic output stays f32 by default (advantage-estimation precision)
        od = jnp.float32 if out_dtype is None else out_dtype
        out = _fused_call(x, packed, softmax_dim=0, include_pi=False,
                          out_dtype=od)
        return out[:, A:A + 1]
    elif model_type == "pi":
        # probabilities are bounded in [0,1]; bf16 store halves output traffic
        od = jnp.bfloat16 if out_dtype is None else out_dtype
        out = _fused_call(x, packed, softmax_dim=softmax_dim, include_pi=True,
                          out_dtype=od)
        return out[:, :A]
    else:
        raise Exception("unknown model_type")


def ann_ppo_forward_both(x, packed, softmax_dim=0, out_dtype=jnp.float32):
    """Fused PPO pattern: both heads from a single pallas_call / HBM pass."""
    A = packed["action_space"]
    out = _fused_call(x, packed, softmax_dim=softmax_dim, include_pi=True,
                      out_dtype=out_dtype)
    return out[:, :A], out[:, A:A + 1]


def init_params(key, state_space, action_space, hidden=256):
    """Deterministic init mimicking nn.Linear's uniform(-1/sqrt(fan_in), ...)."""
    ks = jax.random.split(key, 6)

    def lin(kw, kb, fan_in, fan_out):
        bound = 1.0 / jnp.sqrt(jnp.float32(fan_in))
        w = jax.random.uniform(kw, (fan_in, fan_out), jnp.float32, -bound, bound)
        b = jax.random.uniform(kb, (fan_out,), jnp.float32, -bound, bound)
        return w, b

    w1, b1 = lin(ks[0], ks[1], state_space, hidden)
    wpi, bpi = lin(ks[2], ks[3], hidden, action_space)
    wv, bv = lin(ks[4], ks[5], hidden, 1)
    return dict(w1=w1, b1=b1, wpi=wpi, bpi=bpi, wv=wv, bv=bv)


# TODO(synk): the Adam optimizer / self.data replay buffer of ANNPPO are training
# state, not part of the forward pass, and are not translated.

# ----------------------------- main --------------------------------------------

if __name__ == "__main__":
    key = jax.random.PRNGKey(0)
    k_param, k_x, k_x2, k_x3 = jax.random.split(key, 4)

    state_space, action_space, batch = 16, 4, 8
    params = init_params(k_param, state_space, action_space)
    x = jax.random.normal(k_x, (batch, state_space), jnp.float32)

    # plain-JAX f32 reference
    h_ref = jnp.maximum(x @ params["w1"] + params["b1"], 0.0)
    v_ref = h_ref @ params["wv"] + params["bv"]
    logits_ref = h_ref @ params["wpi"] + params["bpi"]
    pi_d1_ref = jax.nn.softmax(logits_ref, axis=1)
    pi_d0_ref = jax.nn.softmax(logits_ref, axis=0)

    # ---- f32 compute path, f32 outputs (tight tolerances) ----
    packed_f32 = pack_params(params, compute_dtype=jnp.float32)
    v_out = ann_ppo_forward(x, packed_f32, "v")
    pi_d1 = ann_ppo_forward(x, packed_f32, "pi", softmax_dim=1,
                            out_dtype=jnp.float32)
    pi_d0 = ann_ppo_forward(x, packed_f32, "pi", softmax_dim=0,
                            out_dtype=jnp.float32)
    pi_both, v_both = ann_ppo_forward_both(x, packed_f32, softmax_dim=1)
    jax.block_until_ready((v_out, pi_d1, pi_d0, pi_both, v_both))

    assert v_out.shape == (batch, 1)
    assert pi_d1.shape == (batch, action_space)
    assert jnp.allclose(v_out, v_ref, atol=1e-4)
    assert jnp.allclose(pi_d1, pi_d1_ref, atol=1e-3)
    assert jnp.allclose(pi_d0, pi_d0_ref, atol=1e-3)
    assert jnp.allclose(pi_both, pi_d1_ref, atol=1e-3)
    assert jnp.allclose(v_both, v_ref, atol=1e-4)

    # ---- bf16 output store for the pi head (f32 compute) ----
    pi_b16out = ann_ppo_forward(x, packed_f32, "pi", softmax_dim=1)  # bf16 store
    jax.block_until_ready(pi_b16out)
    assert pi_b16out.dtype == jnp.bfloat16
    assert jnp.allclose(pi_b16out.astype(jnp.float32), pi_d1_ref, atol=1e-2)

    # ---- default bf16 compute path (bf16 MXU inputs, f32 accumulation) ----
    packed_bf16 = pack_params(params)                    # compute_dtype=bfloat16
    pi_b16, v_b16 = ann_ppo_forward_both(x, packed_bf16, softmax_dim=1)
    jax.block_until_ready((pi_b16, v_b16))
    assert jnp.allclose(v_b16, v_ref, atol=5e-2)
    assert jnp.allclose(pi_b16, pi_d1_ref, atol=2e-2)

    # ---- multi-tile batch grid with a ragged trailing block (no host pad) ----
    x_big = jax.random.normal(k_x2, (23, state_space), jnp.float32)
    out_big = _fused_call(x_big, packed_f32, softmax_dim=1, include_pi=True,
                          tb=8, out_dtype=jnp.float32)
    pi_big = out_big[:, :action_space]
    h_big = jnp.maximum(x_big @ params["w1"] + params["b1"], 0.0)
    pi_big_ref = jax.nn.softmax(h_big @ params["wpi"] + params["bpi"], axis=1)
    jax.block_until_ready(pi_big)
    assert pi_big.shape == (23, action_space)
    assert jnp.allclose(pi_big, pi_big_ref, atol=1e-3)

    # ---- softmax over the batch axis with a ragged single block (row mask) ----
    x_odd = jax.random.normal(k_x3, (10, state_space), jnp.float32)
    pi_odd = ann_ppo_forward(x_odd, packed_f32, "pi", softmax_dim=0,
                             out_dtype=jnp.float32)
    h_odd = jnp.maximum(x_odd @ params["w1"] + params["b1"], 0.0)
    pi_odd_ref = jax.nn.softmax(h_odd @ params["wpi"] + params["bpi"], axis=0)
    jax.block_until_ready(pi_odd)
    assert jnp.allclose(pi_odd, pi_odd_ref, atol=1e-3)

    print("KERNEL_OK")
</pallas_src>

<mosaic_0001>
module attributes {stable_mosaic.version = 11 : i64} {
  func.func @_fused_kernel(%arg0: i32, %arg1: memref<8x16xf32, #tpu.memory_space<vmem>>, %arg2: memref<16x256xf32, #tpu.memory_space<vmem>>, %arg3: memref<1x256xf32, #tpu.memory_space<vmem>>, %arg4: memref<256x128xf32, #tpu.memory_space<vmem>>, %arg5: memref<1x128xf32, #tpu.memory_space<vmem>>, %arg6: memref<8x128xf32, #tpu.memory_space<vmem>>) attributes {dimension_semantics = [#tpu.dimension_semantics<parallel>], iteration_bounds = array<i64: 1>, scalar_prefetch = 0 : i64, scratch_operands = 0 : i64, tpu.core_type = #tpu.core_type<tc>, window_params = [{transform_indices = @transform_0, window_bounds = array<i64: 8, 16>}, {pipeline_mode = #tpu.pipeline_mode<synchronous>, transform_indices = @transform_1, window_bounds = array<i64: 16, 256>}, {pipeline_mode = #tpu.pipeline_mode<synchronous>, transform_indices = @transform_2, window_bounds = array<i64: 1, 256>}, {pipeline_mode = #tpu.pipeline_mode<synchronous>, transform_indices = @transform_3, window_bounds = array<i64: 256, 128>}, {pipeline_mode = #tpu.pipeline_mode<synchronous>, transform_indices = @transform_4, window_bounds = array<i64: 1, 128>}, {transform_indices = @transform_5, window_bounds = array<i64: 8, 128>}]} {
    %c0 = arith.constant 0 : index
    %c0_0 = arith.constant 0 : index
    %0 = vector.load %arg1[%c0, %c0_0] : memref<8x16xf32, #tpu.memory_space<vmem>>, vector<8x16xf32>
    %c0_1 = arith.constant 0 : index
    %c0_2 = arith.constant 0 : index
    %1 = vector.load %arg2[%c0_1, %c0_2] : memref<16x256xf32, #tpu.memory_space<vmem>>, vector<16x256xf32>
    %cst = arith.constant dense<0.000000e+00> : vector<8x256xf32>
    %2 = tpu.matmul %0, %1, %cst {dimension_numbers = #tpu.dot_dimension_numbers<[1], [0], [0], [1], [0, 0, 1, 1], [], []>} : vector<8x16xf32>, vector<16x256xf32>, vector<8x256xf32> -> vector<8x256xf32>
    %c0_3 = arith.constant 0 : index
    %c0_4 = arith.constant 0 : index
    %3 = vector.load %arg3[%c0_3, %c0_4] : memref<1x256xf32, #tpu.memory_space<vmem>>, vector<1x256xf32>
    %4 = vector.broadcast %3 : vector<1x256xf32> to vector<8x256xf32>
    %5 = arith.addf %2, %4 : vector<8x256xf32>
    %cst_5 = arith.constant 0.000000e+00 : f32
    %6 = vector.broadcast %cst_5 : f32 to vector<8x256xf32>
    %7 = arith.maximumf %5, %6 : vector<8x256xf32>
    %c0_6 = arith.constant 0 : index
    %c0_7 = arith.constant 0 : index
    %8 = vector.load %arg4[%c0_6, %c0_7] : memref<256x128xf32, #tpu.memory_space<vmem>>, vector<256x128xf32>
    %cst_8 = arith.constant dense<0.000000e+00> : vector<8x128xf32>
    %9 = tpu.matmul %7, %8, %cst_8 {dimension_numbers = #tpu.dot_dimension_numbers<[1], [0], [0], [1], [0, 0, 1, 1], [], []>} : vector<8x256xf32>, vector<256x128xf32>, vector<8x128xf32> -> vector<8x128xf32>
    %c0_9 = arith.constant 0 : index
    %c0_10 = arith.constant 0 : index
    %10 = vector.load %arg5[%c0_9, %c0_10] : memref<1x128xf32, #tpu.memory_space<vmem>>, vector<1x128xf32>
    %11 = vector.broadcast %10 : vector<1x128xf32> to vector<8x128xf32>
    %12 = arith.addf %9, %11 : vector<8x128xf32>
    %c0_11 = arith.constant 0 : index
    %c0_12 = arith.constant 0 : index
    %13 = vector.load %arg6[%c0_11, %c0_12] : memref<8x128xf32, #tpu.memory_space<vmem>>, vector<8x128xf32>
    tpu.vector_store %arg6[%c0_11, %c0_12], %12 {strides = array<i32>} : memref<8x128xf32, #tpu.memory_space<vmem>>, vector<8x128xf32>,
    return
  }
  func.func @transform_0(%arg0: i32) -> (i32, i32) {
    %c0_i32 = arith.constant 0 : i32
    %c0_i32_0 = arith.constant 0 : i32
    return %arg0, %c0_i32 : i32, i32
  }
  func.func @transform_1(%arg0: i32) -> (i32, i32) {
    %c0_i32 = arith.constant 0 : i32
    %c0_i32_0 = arith.constant 0 : i32
    %c0_i32_1 = arith.constant 0 : i32
    return %c0_i32, %c0_i32_0 : i32, i32
  }
  func.func @transform_2(%arg0: i32) -> (i32, i32) {
    %c0_i32 = arith.constant 0 : i32
    %c0_i32_0 = arith.constant 0 : i32
    %c0_i32_1 = arith.constant 0 : i32
    return %c0_i32, %c0_i32_0 : i32, i32
  }
  func.func @transform_3(%arg0: i32) -> (i32, i32) {
    %c0_i32 = arith.constant 0 : i32
    %c0_i32_0 = arith.constant 0 : i32
    %c0_i32_1 = arith.constant 0 : i32
    return %c0_i32, %c0_i32_0 : i32, i32
  }
  func.func @transform_4(%arg0: i32) -> (i32, i32) {
    %c0_i32 = arith.constant 0 : i32
    %c0_i32_0 = arith.constant 0 : i32
    %c0_i32_1 = arith.constant 0 : i32
    return %c0_i32, %c0_i32_0 : i32, i32
  }
  func.func @transform_5(%arg0: i32) -> (i32, i32) {
    %c0_i32 = arith.constant 0 : i32
    %c0_i32_0 = arith.constant 0 : i32
    return %arg0, %c0_i32 : i32, i32
  }
}

module attributes {stable_mosaic.version = 11 : i64} {
  func.func @_fused_kernel(%arg0: i32, %arg1: memref<8x16xf32, #tpu.memory_space<vmem>>, %arg2: memref<16x256xf32, #tpu.memory_space<vmem>>, %arg3: memref<1x256xf32, #tpu.memory_space<vmem>>, %arg4: memref<256x128xf32, #tpu.memory_space<vmem>>, %arg5: memref<1x128xf32, #tpu.memory_space<vmem>>, %arg6: memref<8x128xf32, #tpu.memory_space<vmem>>) attributes {dimension_semantics = [#tpu.dimension_semantics<parallel>], iteration_bounds = array<i64: 1>, scalar_prefetch = 0 : i64, scratch_operands = 0 : i64, tpu.core_type = #tpu.core_type<tc>, window_params = [{transform_indices = @transform_0, window_bounds = array<i64: 8, 16>}, {pipeline_mode = #tpu.pipeline_mode<synchronous>, transform_indices = @transform_1, window_bounds = array<i64: 16, 256>}, {pipeline_mode = #tpu.pipeline_mode<synchronous>, transform_indices = @transform_2, window_bounds = array<i64: 1, 256>}, {pipeline_mode = #tpu.pipeline_mode<synchronous>, transform_indices = @transform_3, window_bounds = array<i64: 256, 128>}, {pipeline_mode = #tpu.pipeline_mode<synchronous>, transform_indices = @transform_4, window_bounds = array<i64: 1, 128>}, {transform_indices = @transform_5, window_bounds = array<i64: 8, 128>}]} {
    %c0 = arith.constant 0 : index
    %c0_0 = arith.constant 0 : index
    %0 = vector.load %arg1[%c0, %c0_0] : memref<8x16xf32, #tpu.memory_space<vmem>>, vector<8x16xf32>
    %c0_1 = arith.constant 0 : index
    %c0_2 = arith.constant 0 : index
    %1 = vector.load %arg2[%c0_1, %c0_2] : memref<16x256xf32, #tpu.memory_space<vmem>>, vector<16x256xf32>
    %cst = arith.constant dense<0.000000e+00> : vector<8x256xf32>
    %2 = tpu.matmul %0, %1, %cst {dimension_numbers = #tpu.dot_dimension_numbers<[1], [0], [0], [1], [0, 0, 1, 1], [], []>} : vector<8x16xf32>, vector<16x256xf32>, vector<8x256xf32> -> vector<8x256xf32>
    %c0_3 = arith.constant 0 : index
    %c0_4 = arith.constant 0 : index
    %3 = vector.load %arg3[%c0_3, %c0_4] : memref<1x256xf32, #tpu.memory_space<vmem>>, vector<1x256xf32>
    %4 = vector.broadcast %3 : vector<1x256xf32> to vector<8x256xf32>
    %5 = arith.addf %2, %4 : vector<8x256xf32>
    %cst_5 = arith.constant 0.000000e+00 : f32
    %6 = vector.broadcast %cst_5 : f32 to vector<8x256xf32>
    %7 = arith.maximumf %5, %6 : vector<8x256xf32>
    %c0_6 = arith.constant 0 : index
    %c0_7 = arith.constant 0 : index
    %8 = vector.load %arg4[%c0_6, %c0_7] : memref<256x128xf32, #tpu.memory_space<vmem>>, vector<256x128xf32>
    %cst_8 = arith.constant dense<0.000000e+00> : vector<8x128xf32>
    %9 = tpu.matmul %7, %8, %cst_8 {dimension_numbers = #tpu.dot_dimension_numbers<[1], [0], [0], [1], [0, 0, 1, 1], [], []>} : vector<8x256xf32>, vector<256x128xf32>, vector<8x128xf32> -> vector<8x128xf32>
    %c0_9 = arith.constant 0 : index
    %c0_10 = arith.constant 0 : index
    %10 = vector.load %arg5[%c0_9, %c0_10] : memref<1x128xf32, #tpu.memory_space<vmem>>, vector<1x128xf32>
    %11 = vector.broadcast %10 : vector<1x128xf32> to vector<8x128xf32>
    %12 = arith.addf %9, %11 : vector<8x128xf32>
    %c0_11 = arith.constant 0 : index
    %c0_12 = arith.constant 0 : index
    %13 = vector.load %arg6[%c0_11, %c0_12] : memref<8x128xf32, #tpu.memory_space<vmem>>, vector<8x128xf32>
    tpu.vector_store %arg6[%c0_11, %c0_12], %12 {strides = array<i32>} : memref<8x128xf32, #tpu.memory_space<vmem>>, vector<8x128xf32>,
    return
  }
  func.func @transform_0(%arg0: i32) -> (i32, i32) {
    %c0_i32 = arith.constant 0 : i32
    %c0_i32_0 = arith.constant 0 : i32
    return %arg0, %c0_i32 : i32, i32
  }
  func.func @transform_1(%arg0: i32) -> (i32, i32) {
    %c0_i32 = arith.constant 0 : i32
    %c0_i32_0 = arith.constant 0 : i32
    %c0_i32_1 = arith.constant 0 : i32
    return %c0_i32, %c0_i32_0 : i32, i32
  }
  func.func @transform_2(%arg0: i32) -> (i32, i32) {
    %c0_i32 = arith.constant 0 : i32
    %c0_i32_0 = arith.constant 0 : i32
    %c0_i32_1 = arith.constant 0 : i32
    return %c0_i32, %c0_i32_0 : i32, i32
  }
  func.func @transform_3(%arg0: i32) -> (i32, i32) {
    %c0_i32 = arith.constant 0 : i32
    %c0_i32_0 = arith.constant 0 : i32
    %c0_i32_1 = arith.constant 0 : i32
    return %c0_i32, %c0_i32_0 : i32, i32
  }
  func.func @transform_4(%arg0: i32) -> (i32, i32) {
    %c0_i32 = arith.constant 0 : i32
    %c0_i32_0 = arith.constant 0 : i32
    %c0_i32_1 = arith.constant 0 : i32
    return %c0_i32, %c0_i32_0 : i32, i32
  }
  func.func @transform_5(%arg0: i32) -> (i32, i32) {
    %c0_i32 = arith.constant 0 : i32
    %c0_i32_0 = arith.constant 0 : i32
    return %arg0, %c0_i32 : i32, i32
  }
}

</mosaic_0001>

<bundles_post_ra>
// kernel: tpu_custom_call.1
= control target key start
LH: loop header
LB: loop body
LE: loop exit
PB: predicated region body
PF: predicated region fallthrough
CT: control target
= control target key end

     0   :  { %10 = vsyncpa [#allocation3], 0  ;;  %s430_s0 = inlined_call_operand.hbm [shape: f32[8,16], index: 0, kind: input, shape index: {}]   ;;  %s431_s1 = inlined_call_operand.hbm [shape: f32[16,256], index: 1, kind: input, shape index: {}]   ;;  %s432_s2 = inlined_call_operand.hbm [shape: f32[1,256], index: 2, kind: input, shape index: {}]   ;;  %s433_s3 = inlined_call_operand.hbm [shape: f32[256,128], index: 3, kind: input, shape index: {}]   ;;  %s434_s4 = inlined_call_operand.vmem [shape: f32[1,128], index: 4, kind: input, shape index: {}]   ;;  %s435_s5 = inlined_call_operand.hbm [shape: f32[8,128], index: 5, kind: output, shape index: {}]  }
   0x1   :  { %11 = vsyncpa [#allocation6], 0 }
   0x2   :  { %12 = vsyncpa [#allocation9], 0  ;;  %s29_s20 = sshll.u32 %s431_s1, 4  ;;  %s30_s20 = int_to_ptr.hbm [resolvable:$true] %s29_s20 }
   0x3   :  { %13 = vsyncpa [#allocation4], 0  ;;  %s373_s21 = smov [#allocation5]   ;;  %s19_s25 = sshll.u32 %s430_s0, 4  ;;  %s20_s25 = int_to_ptr.hbm [resolvable:$true] %s19_s25 }
   0x4   :  { %s31_s22 = sshll.u32 %s373_s21, 4  ;;  %s374_s26 = smov 256   ;;  %s32_s22 = int_to_ptr.vmem [resolvable:$true] %s31_s22 }
   0x5   :  { %s375_s27 = smov 16   ;;  %s376_s28 = smov [#allocation2]  }
   0x6   :  { %37 = dma.hbm_to_vmem [thread:$0]  %s30_s20, 512, %s32_s22, [#allocation6], %s374_s26, %s374_s26, %s375_s27  }
   0x7   :  { %s21_s29 = sshll.u32 %s376_s28, 4  ;;  %s43_s7 = sshll.u32 %s432_s2, 4  ;;  %s22_s29 = int_to_ptr.vmem [resolvable:$true] %s21_s29  ;;  %s44_s7 = int_to_ptr.hbm [resolvable:$true] %s43_s7 }
   0x8   :  { %24 = dma.hbm_to_vmem [thread:$0]  %s20_s25, 128, %s22_s29, [#allocation3]  }
   0x9   :  { %s53_s9 = sshll.u32 %s433_s3, 4  ;;  %s377_s10 = smov [#allocation7]   ;;  %s54_s9 = int_to_ptr.hbm [resolvable:$true] %s53_s9 }
   0xa   :  { %s45_s11 = sshll.u32 %s377_s10, 4  ;;  %s378_s0 = smov [#allocation8]   ;;  %s46_s11 = int_to_ptr.vmem [resolvable:$true] %s45_s11 }
   0xb   :  { %48 = dma.hbm_to_vmem [thread:$0]  %s44_s7, 32, %s46_s11, [#allocation6]  }
   0xc   :  { %s55_s12 = sshll.u32 %s378_s0, 4  ;;  %s379_s13 = smov 128   ;;  %s56_s12 = int_to_ptr.vmem [resolvable:$true] %s55_s12 }
   0xd   :  { %s380_s14 = smov 8  }
   0xe   :  { %61 = dma.hbm_to_vmem [thread:$0]  %s54_s9, 4096, %s56_s12, [#allocation9], %s379_s13, %s379_s13, %s380_s14  }
   0xf   :  { %365 = dma.done.wait [#allocation3], 128  }
  0x10   :  { %366 = vsyncadd [#allocation3], 4294967168 }
  0x11   :  { %367 = dma.done.wait [#allocation6], 544  }
  0x12   :  { %368 = vsyncadd [#allocation6], 4294966752 }
  0x13   :  { %369 = dma.done.wait [#allocation9], 4096  }
  0x14   :  { %370 = vsyncadd [#allocation9], 4294963200  ;;  %v83_v0 = vld [vmem:[#allocation5 + $0x10] sm:$0xff]  ;;  %v81_v1 = vld [vmem:[#allocation5] sm:$0xff]  ;;  %vm91_vm0 = vcmask 130048   ;;  %s381_s15 = smov [#allocation10]  }
  0x15   :  { %v84_v2 = vld [vmem:[#allocation5 + $0x18] sm:$0xff]  ;;  %109 = vmatpush.msra.mxu0 %v83_v0  ;;  %v82_v4 = vld [vmem:[#allocation5 + $0x8] sm:$0xff]  ;;  %v85_v37 = vld [vmem:[#allocation7] sm:$0x3]  ;;  %s219_s16 = sshll.u32 %s381_s15, 4  ;;  %s221_s19 = sshll.u32 %s435_s5, 4  ;;  %s220_s16 = int_to_ptr.vmem [resolvable:$true] %s219_s16  ;;  %s222_s19 = int_to_ptr.hbm [resolvable:$true] %s221_s19 }
  0x16   :  { %129 = vmatpush.msra.mxu1 %v84_v2  ;;  %v80_v3 = vld [vmem:[#allocation2] sm:$0xff]  ;;  %v150_v8 = vld [vmem:[#allocation8 + $0x68] sm:$0xff]  ;;  %v149_v10 = vld [vmem:[#allocation8 + $0x60] sm:$0xff]  ;;  %v87_v38 = vperm.slane %v85_v37, 0  ;;  %v88_v39 = vperm.slane %v85_v37, 1 }
  0x17   :  { %v152_v5 = vld [vmem:[#allocation8 + $0x78] sm:$0xff]  ;;  %v151_v6 = vld [vmem:[#allocation8 + $0x70] sm:$0xff]  ;;  %110 = vmatpush.msra.mxu0 %v81_v1  ;;  %v166_v11 = vld [vmem:[#allocation8 + $0xe8] sm:$0xff] }
  0x18   :  { %173 = vmatpush.msra.mxu2 %v152_v5  ;;  %v168_v7 = vld [vmem:[#allocation8 + $0xf8] sm:$0xff]  ;;  %130 = vmatpush.msra.mxu1 %v82_v4  ;;  %v167_v9 = vld [vmem:[#allocation8 + $0xf0] sm:$0xff]  ;;  %v165_v13 = vld [vmem:[#allocation8 + $0xe0] sm:$0xff] }
  0x19   :  { %233 = vmatmul.msk.f32.vlgmr.msra.gmra.mxu0 %vm91_vm0, %v80_v3  ;;  %234 = vmatmul.msk.f32.vlgmr.msra.gmra.mxu1 %vm91_vm0, %v80_v3  ;;  %v148_v12 = vld [vmem:[#allocation8 + $0x58] sm:$0xff]  ;;  %v147_v14 = vld [vmem:[#allocation8 + $0x50] sm:$0xff]  ;;  %v146_v16 = vld [vmem:[#allocation8 + $0x48] sm:$0xff] }
  0x1a   :  { %174 = vmatpush.msra.mxu2 %v151_v6  ;;  %193 = vmatpush.msra.mxu3 %v168_v7  ;;  %v164_v15 = vld [vmem:[#allocation8 + $0xd8] sm:$0xff]  ;;  %v163_v17 = vld [vmem:[#allocation8 + $0xd0] sm:$0xff]  ;;  %v145_v18 = vld [vmem:[#allocation8 + $0x40] sm:$0xff] }
  0x1b   :  { %v162_v19 = vld [vmem:[#allocation8 + $0xc8] sm:$0xff]  ;;  %v144_v20 = vld [vmem:[#allocation8 + $0x38] sm:$0xff]  ;;  %v161_v21 = vld [vmem:[#allocation8 + $0xc0] sm:$0xff] }
  0x1c   :  { %175 = vmatpush.msra.mxu2 %v150_v8  ;;  %194 = vmatpush.msra.mxu3 %v167_v9  ;;  %v143_v22 = vld [vmem:[#allocation8 + $0x30] sm:$0xff]  ;;  %v160_v23 = vld [vmem:[#allocation8 + $0xb8] sm:$0xff]  ;;  %v142_v24 = vld [vmem:[#allocation8 + $0x28] sm:$0xff] }
  0x1d   :  { %v159_v25 = vld [vmem:[#allocation8 + $0xb0] sm:$0xff]  ;;  %v141_v26 = vld [vmem:[#allocation8 + $0x20] sm:$0xff]  ;;  %v158_v27 = vld [vmem:[#allocation8 + $0xa8] sm:$0xff] }
  0x1e   :  { %176 = vmatpush.msra.mxu2 %v149_v10  ;;  %195 = vmatpush.msra.mxu3 %v166_v11  ;;  %v140_v28 = vld [vmem:[#allocation8 + $0x18] sm:$0xff]  ;;  %v157_v29 = vld [vmem:[#allocation8 + $0xa0] sm:$0xff]  ;;  %v139_v30 = vld [vmem:[#allocation8 + $0x10] sm:$0xff] }
  0x1f   :  { %v156_v31 = vld [vmem:[#allocation8 + $0x98] sm:$0xff]  ;;  %v138_v32 = vld [vmem:[#allocation8 + $0x8] sm:$0xff]  ;;  %v155_v33 = vld [vmem:[#allocation8 + $0x90] sm:$0xff] }
  0x20   :  { %177 = vmatpush.msra.mxu2 %v148_v12  ;;  %196 = vmatpush.msra.mxu3 %v165_v13  ;;  %v137_v34 = vld [vmem:[#allocation8] sm:$0xff]  ;;  %v154_v35 = vld [vmem:[#allocation8 + $0x88] sm:$0xff]  ;;  %v244_v46 = vld [vmem:[%s434_s4] ss:$0 sm:$0xff] }
  0x21   :  { %v153_v36 = vld [vmem:[#allocation8 + $0x80] sm:$0xff] }
  0x22   :  { %178 = vmatpush.msra.mxu2 %v147_v14  ;;  %197 = vmatpush.msra.mxu3 %v164_v15 }
  0x24   :  { %179 = vmatpush.msra.mxu2 %v146_v16  ;;  %198 = vmatpush.msra.mxu3 %v163_v17 }
  0x26   :  { %180 = vmatpush.msra.mxu2 %v145_v18  ;;  %199 = vmatpush.msra.mxu3 %v162_v19 }
  0x28   :  { %181 = vmatpush.msra.mxu2 %v144_v20  ;;  %200 = vmatpush.msra.mxu3 %v161_v21 }
  0x2a   :  { %182 = vmatpush.msra.mxu2 %v143_v22  ;;  %201 = vmatpush.msra.mxu3 %v160_v23 }
  0x2c   :  { %183 = vmatpush.msra.mxu2 %v142_v24  ;;  %202 = vmatpush.msra.mxu3 %v159_v25 }
  0x2e   :  { %184 = vmatpush.msra.mxu2 %v141_v26  ;;  %203 = vmatpush.msra.mxu3 %v158_v27 }
  0x30   :  { %185 = vmatpush.msra.mxu2 %v140_v28  ;;  %204 = vmatpush.msra.mxu3 %v157_v29 }
  0x32   :  { %186 = vmatpush.msra.mxu2 %v139_v30  ;;  %205 = vmatpush.msra.mxu3 %v156_v31 }
  0x34   :  { %187 = vmatpush.msra.mxu2 %v138_v32  ;;  %206 = vmatpush.msra.mxu3 %v155_v33 }
  0x36   :  { %188 = vmatpush.msra.mxu2 %v137_v34  ;;  %207 = vmatpush.msra.mxu3 %v154_v35 }
  0x38   :  { %208 = vmatpush.msra.mxu3 %v153_v36 }
  0x96   :  { %v112_v40 = vpop.f32.mrf.mxu0  ;;  %v132_v41 = vpop.f32.mrf.mxu1 }
  0x97   :  { %v113_v42 = vadd.f32 %v112_v40, %v87_v38  ;;  %v133_v43 = vadd.f32 %v132_v41, %v88_v39 }
  0x99   :  { %v135_v44 = vmax.f32 %v113_v42, 0.0  ;;  %v136_v45 = vmax.f32 %v133_v43, 0.0 }
  0x9b   :  { %189 = vmatmul.f32.vlgmr.msra.gmra.mxu2 %v135_v44  ;;  %209 = vmatmul.f32.vlgmr.msra.gmra.mxu3 %v136_v45 }
 0x11e   :  { %v190_v47 = vpop.f32.mrf.mxu2  ;;  %v210_v48 = vpop.f32.mrf.mxu3 }
 0x11f   :  { %v191_v49 = vadd.f32 %v244_v46, %v190_v47 }
 0x121   :  { %v211_v50 = vadd.f32 %v210_v48, %v191_v49 }
 0x123   :  { %213 = vst [vmem:[#allocation10] sm:$0xff] %v211_v50 }
 0x124   :  { %224 = dma.vmem_to_hbm [thread:$0]  %s220_s16, 128, %s222_s19, [#allocation4]  }
 0x125   :  { %371 = dma.done.wait [#allocation4], 128  }
 0x126   :  { %372 = vsyncadd [#allocation4], 4294967168 }
 0x127   :  { %229 = vsyncpa [#allocation3], 1 }
 0x128   :  { %230 = vsyncpa [#allocation6], 1 }
 0x129   :  { %231 = vsyncpa [#allocation9], 1 }
 0x12a   :  { %232 = vsyncpa [#allocation4], 1 }

// kernel: tpu_custom_call.1
= control target key start
LH: loop header
LB: loop body
LE: loop exit
PB: predicated region body
PF: predicated region fallthrough
CT: control target
= control target key end

     0   :  { %10 = vsyncpa [#allocation3], 0  ;;  %s430_s0 = inlined_call_operand.hbm [shape: f32[8,16], index: 0, kind: input, shape index: {}]   ;;  %s431_s1 = inlined_call_operand.hbm [shape: f32[16,256], index: 1, kind: input, shape index: {}]   ;;  %s432_s2 = inlined_call_operand.hbm [shape: f32[1,256], index: 2, kind: input, shape index: {}]   ;;  %s433_s3 = inlined_call_operand.hbm [shape: f32[256,128], index: 3, kind: input, shape index: {}]   ;;  %s434_s4 = inlined_call_operand.vmem [shape: f32[1,128], index: 4, kind: input, shape index: {}]   ;;  %s435_s5 = inlined_call_operand.hbm [shape: f32[8,128], index: 5, kind: output, shape index: {}]  }
   0x1   :  { %11 = vsyncpa [#allocation6], 0 }
   0x2   :  { %12 = vsyncpa [#allocation9], 0  ;;  %s29_s20 = sshll.u32 %s431_s1, 4  ;;  %s30_s20 = int_to_ptr.hbm [resolvable:$true] %s29_s20 }
   0x3   :  { %13 = vsyncpa [#allocation4], 0  ;;  %s373_s21 = smov [#allocation5]   ;;  %s19_s25 = sshll.u32 %s430_s0, 4  ;;  %s20_s25 = int_to_ptr.hbm [resolvable:$true] %s19_s25 }
   0x4   :  { %s31_s22 = sshll.u32 %s373_s21, 4  ;;  %s374_s26 = smov 256   ;;  %s32_s22 = int_to_ptr.vmem [resolvable:$true] %s31_s22 }
   0x5   :  { %s375_s27 = smov 16   ;;  %s376_s28 = smov [#allocation2]  }
   0x6   :  { %37 = dma.hbm_to_vmem [thread:$0]  %s30_s20, 512, %s32_s22, [#allocation6], %s374_s26, %s374_s26, %s375_s27  }
   0x7   :  { %s21_s29 = sshll.u32 %s376_s28, 4  ;;  %s43_s7 = sshll.u32 %s432_s2, 4  ;;  %s22_s29 = int_to_ptr.vmem [resolvable:$true] %s21_s29  ;;  %s44_s7 = int_to_ptr.hbm [resolvable:$true] %s43_s7 }
   0x8   :  { %24 = dma.hbm_to_vmem [thread:$0]  %s20_s25, 128, %s22_s29, [#allocation3]  }
   0x9   :  { %s53_s9 = sshll.u32 %s433_s3, 4  ;;  %s377_s10 = smov [#allocation7]   ;;  %s54_s9 = int_to_ptr.hbm [resolvable:$true] %s53_s9 }
   0xa   :  { %s45_s11 = sshll.u32 %s377_s10, 4  ;;  %s378_s0 = smov [#allocation8]   ;;  %s46_s11 = int_to_ptr.vmem [resolvable:$true] %s45_s11 }
   0xb   :  { %48 = dma.hbm_to_vmem [thread:$0]  %s44_s7, 32, %s46_s11, [#allocation6]  }
   0xc   :  { %s55_s12 = sshll.u32 %s378_s0, 4  ;;  %s379_s13 = smov 128   ;;  %s56_s12 = int_to_ptr.vmem [resolvable:$true] %s55_s12 }
   0xd   :  { %s380_s14 = smov 8  }
   0xe   :  { %61 = dma.hbm_to_vmem [thread:$0]  %s54_s9, 4096, %s56_s12, [#allocation9], %s379_s13, %s379_s13, %s380_s14  }
   0xf   :  { %365 = dma.done.wait [#allocation3], 128  }
  0x10   :  { %366 = vsyncadd [#allocation3], 4294967168 }
  0x11   :  { %367 = dma.done.wait [#allocation6], 544  }
  0x12   :  { %368 = vsyncadd [#allocation6], 4294966752 }
  0x13   :  { %369 = dma.done.wait [#allocation9], 4096  }
  0x14   :  { %370 = vsyncadd [#allocation9], 4294963200  ;;  %v83_v0 = vld [vmem:[#allocation5 + $0x10] sm:$0xff]  ;;  %v81_v1 = vld [vmem:[#allocation5] sm:$0xff]  ;;  %vm91_vm0 = vcmask 130048   ;;  %s381_s15 = smov [#allocation10]  }
  0x15   :  { %v84_v2 = vld [vmem:[#allocation5 + $0x18] sm:$0xff]  ;;  %109 = vmatpush.msra.mxu0 %v83_v0  ;;  %v82_v4 = vld [vmem:[#allocation5 + $0x8] sm:$0xff]  ;;  %v85_v37 = vld [vmem:[#allocation7] sm:$0x3]  ;;  %s219_s16 = sshll.u32 %s381_s15, 4  ;;  %s221_s19 = sshll.u32 %s435_s5, 4  ;;  %s220_s16 = int_to_ptr.vmem [resolvable:$true] %s219_s16  ;;  %s222_s19 = int_to_ptr.hbm [resolvable:$true] %s221_s19 }
  0x16   :  { %129 = vmatpush.msra.mxu1 %v84_v2  ;;  %v80_v3 = vld [vmem:[#allocation2] sm:$0xff]  ;;  %v150_v8 = vld [vmem:[#allocation8 + $0x68] sm:$0xff]  ;;  %v149_v10 = vld [vmem:[#allocation8 + $0x60] sm:$0xff]  ;;  %v87_v38 = vperm.slane %v85_v37, 0  ;;  %v88_v39 = vperm.slane %v85_v37, 1 }
  0x17   :  { %v152_v5 = vld [vmem:[#allocation8 + $0x78] sm:$0xff]  ;;  %v151_v6 = vld [vmem:[#allocation8 + $0x70] sm:$0xff]  ;;  %110 = vmatpush.msra.mxu0 %v81_v1  ;;  %v166_v11 = vld [vmem:[#allocation8 + $0xe8] sm:$0xff] }
  0x18   :  { %173 = vmatpush.msra.mxu2 %v152_v5  ;;  %v168_v7 = vld [vmem:[#allocation8 + $0xf8] sm:$0xff]  ;;  %130 = vmatpush.msra.mxu1 %v82_v4  ;;  %v167_v9 = vld [vmem:[#allocation8 + $0xf0] sm:$0xff]  ;;  %v165_v13 = vld [vmem:[#allocation8 + $0xe0] sm:$0xff] }
  0x19   :  { %233 = vmatmul.msk.f32.vlgmr.msra.gmra.mxu0 %vm91_vm0, %v80_v3  ;;  %234 = vmatmul.msk.f32.vlgmr.msra.gmra.mxu1 %vm91_vm0, %v80_v3  ;;  %v148_v12 = vld [vmem:[#allocation8 + $0x58] sm:$0xff]  ;;  %v147_v14 = vld [vmem:[#allocation8 + $0x50] sm:$0xff]  ;;  %v146_v16 = vld [vmem:[#allocation8 + $0x48] sm:$0xff] }
  0x1a   :  { %174 = vmatpush.msra.mxu2 %v151_v6  ;;  %193 = vmatpush.msra.mxu3 %v168_v7  ;;  %v164_v15 = vld [vmem:[#allocation8 + $0xd8] sm:$0xff]  ;;  %v163_v17 = vld [vmem:[#allocation8 + $0xd0] sm:$0xff]  ;;  %v145_v18 = vld [vmem:[#allocation8 + $0x40] sm:$0xff] }
  0x1b   :  { %v162_v19 = vld [vmem:[#allocation8 + $0xc8] sm:$0xff]  ;;  %v144_v20 = vld [vmem:[#allocation8 + $0x38] sm:$0xff]  ;;  %v161_v21 = vld [vmem:[#allocation8 + $0xc0] sm:$0xff] }
  0x1c   :  { %175 = vmatpush.msra.mxu2 %v150_v8  ;;  %194 = vmatpush.msra.mxu3 %v167_v9  ;;  %v143_v22 = vld [vmem:[#allocation8 + $0x30] sm:$0xff]  ;;  %v160_v23 = vld [vmem:[#allocation8 + $0xb8] sm:$0xff]  ;;  %v142_v24 = vld [vmem:[#allocation8 + $0x28] sm:$0xff] }
  0x1d   :  { %v159_v25 = vld [vmem:[#allocation8 + $0xb0] sm:$0xff]  ;;  %v141_v26 = vld [vmem:[#allocation8 + $0x20] sm:$0xff]  ;;  %v158_v27 = vld [vmem:[#allocation8 + $0xa8] sm:$0xff] }
  0x1e   :  { %176 = vmatpush.msra.mxu2 %v149_v10  ;;  %195 = vmatpush.msra.mxu3 %v166_v11  ;;  %v140_v28 = vld [vmem:[#allocation8 + $0x18] sm:$0xff]  ;;  %v157_v29 = vld [vmem:[#allocation8 + $0xa0] sm:$0xff]  ;;  %v139_v30 = vld [vmem:[#allocation8 + $0x10] sm:$0xff] }
  0x1f   :  { %v156_v31 = vld [vmem:[#allocation8 + $0x98] sm:$0xff]  ;;  %v138_v32 = vld [vmem:[#allocation8 + $0x8] sm:$0xff]  ;;  %v155_v33 = vld [vmem:[#allocation8 + $0x90] sm:$0xff] }
  0x20   :  { %177 = vmatpush.msra.mxu2 %v148_v12  ;;  %196 = vmatpush.msra.mxu3 %v165_v13  ;;  %v137_v34 = vld [vmem:[#allocation8] sm:$0xff]  ;;  %v154_v35 = vld [vmem:[#allocation8 + $0x88] sm:$0xff]  ;;  %v244_v46 = vld [vmem:[%s434_s4] ss:$0 sm:$0xff] }
  0x21   :  { %v153_v36 = vld [vmem:[#allocation8 + $0x80] sm:$0xff] }
  0x22   :  { %178 = vmatpush.msra.mxu2 %v147_v14  ;;  %197 = vmatpush.msra.mxu3 %v164_v15 }
  0x24   :  { %179 = vmatpush.msra.mxu2 %v146_v16  ;;  %198 = vmatpush.msra.mxu3 %v163_v17 }
  0x26   :  { %180 = vmatpush.msra.mxu2 %v145_v18  ;;  %199 = vmatpush.msra.mxu3 %v162_v19 }
  0x28   :  { %181 = vmatpush.msra.mxu2 %v144_v20  ;;  %200 = vmatpush.msra.mxu3 %v161_v21 }
  0x2a   :  { %182 = vmatpush.msra.mxu2 %v143_v22  ;;  %201 = vmatpush.msra.mxu3 %v160_v23 }
  0x2c   :  { %183 = vmatpush.msra.mxu2 %v142_v24  ;;  %202 = vmatpush.msra.mxu3 %v159_v25 }
  0x2e   :  { %184 = vmatpush.msra.mxu2 %v141_v26  ;;  %203 = vmatpush.msra.mxu3 %v158_v27 }
  0x30   :  { %185 = vmatpush.msra.mxu2 %v140_v28  ;;  %204 = vmatpush.msra.mxu3 %v157_v29 }
  0x32   :  { %186 = vmatpush.msra.mxu2 %v139_v30  ;;  %205 = vmatpush.msra.mxu3 %v156_v31 }
  0x34   :  { %187 = vmatpush.msra.mxu2 %v138_v32  ;;  %206 = vmatpush.msra.mxu3 %v155_v33 }
  0x36   :  { %188 = vmatpush.msra.mxu2 %v137_v34  ;;  %207 = vmatpush.msra.mxu3 %v154_v35 }
  0x38   :  { %208 = vmatpush.msra.mxu3 %v153_v36 }
  0x96   :  { %v112_v40 = vpop.f32.mrf.mxu0  ;;  %v132_v41 = vpop.f32.mrf.mxu1 }
  0x97   :  { %v113_v42 = vadd.f32 %v112_v40, %v87_v38  ;;  %v133_v43 = vadd.f32 %v132_v41, %v88_v39 }
  0x99   :  { %v135_v44 = vmax.f32 %v113_v42, 0.0  ;;  %v136_v45 = vmax.f32 %v133_v43, 0.0 }
  0x9b   :  { %189 = vmatmul.f32.vlgmr.msra.gmra.mxu2 %v135_v44  ;;  %209 = vmatmul.f32.vlgmr.msra.gmra.mxu3 %v136_v45 }
 0x11e   :  { %v190_v47 = vpop.f32.mrf.mxu2  ;;  %v210_v48 = vpop.f32.mrf.mxu3 }
 0x11f   :  { %v191_v49 = vadd.f32 %v244_v46, %v190_v47 }
 0x121   :  { %v211_v50 = vadd.f32 %v210_v48, %v191_v49 }
 0x123   :  { %213 = vst [vmem:[#allocation10] sm:$0xff] %v211_v50 }
 0x124   :  { %224 = dma.vmem_to_hbm [thread:$0]  %s220_s16, 128, %s222_s19, [#allocation4]  }
 0x125   :  { %371 = dma.done.wait [#allocation4], 128  }
 0x126   :  { %372 = vsyncadd [#allocation4], 4294967168 }
 0x127   :  { %229 = vsyncpa [#allocation3], 1 }
 0x128   :  { %230 = vsyncpa [#allocation6], 1 }
 0x129   :  { %231 = vsyncpa [#allocation9], 1 }
 0x12a   :  { %232 = vsyncpa [#allocation4], 1 }

</bundles_post_ra>
